<compile_context>
chip_gen: v6e
topology: v6e:2x2x1
jax: 0.10.0
libtpu: 0.0.40
codegen_flags: <defaults>
</compile_context>

<pallas_src>
import functools

import jax
import jax.numpy as jnp
import numpy as np
from jax import lax
from jax.experimental import pallas as pl
from jax.experimental.pallas import tpu as pltpu

_LANE = 128
_MAX_BLOCK_ROWS = 4096          # (4096, 128) f32 = 2 MiB per input buffer
_VMEM_LIMIT = 48 * 1024 * 1024  # explicit scoped-VMEM budget (safe on v5e/v6e/v7x)


def _round_up(x, m):
    return (x + m - 1) // m * m


def _sublane_multiple(dtype):
    # 4-byte -> 8 rows, 2-byte -> 16 rows, 1-byte -> 32 rows per (.., 128) tile.
    return max(8, 32 // jnp.dtype(dtype).itemsize)


def _choose_block_rows(slab_rows, sub):
    """Pick a block height: big (HBM-bound), multiple of `sub`, and giving a
    grid of >= 2 steps whenever possible (megacore split on v7x)."""
    if slab_rows <= sub:
        return slab_rows                       # single full-extent block
    half = _round_up(pl.cdiv(slab_rows, 2), sub)
    return max(sub, min(_MAX_BLOCK_ROWS, half))


# ---------------------------------------------------------------------------
# Kernels
# ---------------------------------------------------------------------------
def _l1_none_kernel(scale_ref, pred_ref, tgt_ref, out_ref):
    s = scale_ref[0]
    d = jnp.abs(pred_ref[...].astype(jnp.float32)
                - tgt_ref[...].astype(jnp.float32))
    out_ref[...] = (d * s).astype(out_ref.dtype)


def _l1_none_w_kernel(scale_ref, pred_ref, tgt_ref, w_ref, out_ref):
    s = scale_ref[0]
    d = jnp.abs(pred_ref[...].astype(jnp.float32)
                - tgt_ref[...].astype(jnp.float32))
    d = d * w_ref[...].astype(jnp.float32)
    out_ref[...] = (d * s).astype(out_ref.dtype)


def _mask_tail(d, rows_valid, block_rows):
    # Zero rows that fall past the real data (ragged last grid block).
    # NOTE: applied AFTER the weight multiply so garbage/NaN reads cannot leak.
    row0 = pl.program_id(0) * block_rows
    row_ids = row0 + lax.broadcasted_iota(jnp.int32, d.shape, 0)
    return jnp.where(row_ids < rows_valid, d, 0.0)


def _store_partial(d, out_ref, rows_valid, block_rows, needs_mask):
    """Store a full (8, 128) per-block partial sum (unmasked full-tile vst)."""
    def tile_sum(x):
        return jnp.sum(x.reshape(block_rows // 8, 8, _LANE), axis=0)

    if not needs_mask:
        out_ref[...] = tile_sum(d)
    else:
        is_last = pl.program_id(0) == pl.num_programs(0) - 1

        @pl.when(is_last)
        def _():
            out_ref[...] = tile_sum(_mask_tail(d, rows_valid, block_rows))

        @pl.when(jnp.logical_not(is_last))
        def _():
            out_ref[...] = tile_sum(d)


def _l1_psum_kernel(pred_ref, tgt_ref, out_ref, *,
                    rows_valid, block_rows, needs_mask):
    d = jnp.abs(pred_ref[...].astype(jnp.float32)
                - tgt_ref[...].astype(jnp.float32))
    _store_partial(d, out_ref, rows_valid, block_rows, needs_mask)


def _l1_psum_w_kernel(pred_ref, tgt_ref, w_ref, out_ref, *,
                      rows_valid, block_rows, needs_mask):
    d = jnp.abs(pred_ref[...].astype(jnp.float32)
                - tgt_ref[...].astype(jnp.float32))
    d = d * w_ref[...].astype(jnp.float32)
    _store_partial(d, out_ref, rows_valid, block_rows, needs_mask)


# ---------------------------------------------------------------------------
# Wrapper
# ---------------------------------------------------------------------------
@functools.partial(jax.jit, static_argnames=("reduction",))
def _l1_pallas(pred, target, weight, scale, *, reduction):
    """pred/target (and optional weight) have identical shape.

    reduction: 'none' -> elementwise |pred-target| (*weight) * scale (pred.dtype)
               'sum'  -> scalar sum(|pred-target| (*weight)) * scale (float32)

    `scale` is a runtime f32 scalar (no recompiles across avg_factor values).
    """
    orig_shape = pred.shape
    orig_dtype = pred.dtype
    n = int(np.prod(orig_shape))

    dtypes = [pred.dtype, target.dtype]
    if weight is not None:
        dtypes.append(weight.dtype)
    sub = max(_sublane_multiple(dt) for dt in dtypes)

    pred_f = pred.reshape(-1)
    tgt_f = target.reshape(-1)
    w_f = weight.reshape(-1) if weight is not None else None

    scale = jnp.asarray(scale, jnp.float32)

    def take(flat, count):
        return flat if count == n else flat[:count]

    compiler_params = pltpu.CompilerParams(
        dimension_semantics=("parallel",),
        vmem_limit_bytes=_VMEM_LIMIT)

    # ----------------------------- 'none' path -----------------------------
    if reduction == "none":
        lane_n = (n // _LANE) * _LANE
        scale_arr = scale.reshape(1)

        if lane_n == 0:
            # Tiny tensor (< 128 elements): not worth a kernel launch.
            d = jnp.abs(pred_f.astype(jnp.float32) - tgt_f.astype(jnp.float32))
            if w_f is not None:
                d = d * w_f.astype(jnp.float32)
            return (d * scale).astype(orig_dtype).reshape(orig_shape)

        slab_rows = lane_n // _LANE
        block_rows = _choose_block_rows(slab_rows, sub)
        grid = (pl.cdiv(slab_rows, block_rows),)
        slab_spec = pl.BlockSpec((block_rows, _LANE), lambda i: (i, 0))

        inputs = [scale_arr,
                  take(pred_f, lane_n).reshape(slab_rows, _LANE),
                  take(tgt_f, lane_n).reshape(slab_rows, _LANE)]
        in_specs = [pl.BlockSpec(memory_space=pltpu.MemorySpace.SMEM),
                    slab_spec, slab_spec]
        kernel = _l1_none_kernel
        if w_f is not None:
            inputs.append(take(w_f, lane_n).reshape(slab_rows, _LANE))
            in_specs.append(slab_spec)
            kernel = _l1_none_w_kernel

        out_slab = pl.pallas_call(
            kernel,
            out_shape=jax.ShapeDtypeStruct((slab_rows, _LANE), orig_dtype),
            grid_spec=pltpu.PrefetchScalarGridSpec(
                num_scalar_prefetch=0,
                grid=grid,
                in_specs=in_specs,
                out_specs=pl.BlockSpec((block_rows, _LANE), lambda i: (i, 0)),
            ),
            compiler_params=compiler_params,
        )(*inputs)

        out_flat = out_slab.reshape(-1)
        if lane_n != n:
            # <128-element ragged tail handled with a tiny jnp op instead of
            # padding full-size input copies around an HBM-bound kernel.
            tail = jnp.abs(pred_f[lane_n:].astype(jnp.float32)
                           - tgt_f[lane_n:].astype(jnp.float32))
            if w_f is not None:
                tail = tail * w_f[lane_n:].astype(jnp.float32)
            tail = (tail * scale).astype(orig_dtype)
            out_flat = jnp.concatenate([out_flat, tail])
        return out_flat.reshape(orig_shape)

    # ------------------------------ 'sum' path -----------------------------
    unit = sub * _LANE
    prefix_n = (n // unit) * unit
    total = jnp.zeros((), jnp.float32)

    if prefix_n:
        slab_rows = prefix_n // _LANE          # multiple of `sub` (>= 8)
        block_rows = _choose_block_rows(slab_rows, sub)
        grid = (pl.cdiv(slab_rows, block_rows),)
        needs_mask = (slab_rows % block_rows) != 0
        slab_spec = pl.BlockSpec((block_rows, _LANE), lambda i: (i, 0))

        inputs = [take(pred_f, prefix_n).reshape(slab_rows, _LANE),
                  take(tgt_f, prefix_n).reshape(slab_rows, _LANE)]
        in_specs = [slab_spec, slab_spec]
        kernel = _l1_psum_kernel
        if w_f is not None:
            inputs.append(take(w_f, prefix_n).reshape(slab_rows, _LANE))
            in_specs.append(slab_spec)
            kernel = _l1_psum_w_kernel

        # Parallel per-block (8,128) partial sums (full-tile, unmasked stores),
        # reduced to a scalar with a tiny wrapper-side jnp.sum.
        partial = pl.pallas_call(
            functools.partial(kernel, rows_valid=slab_rows,
                              block_rows=block_rows, needs_mask=needs_mask),
            out_shape=jax.ShapeDtypeStruct((grid[0] * 8, _LANE), jnp.float32),
            grid_spec=pltpu.PrefetchScalarGridSpec(
                num_scalar_prefetch=0,
                grid=grid,
                in_specs=in_specs,
                out_specs=pl.BlockSpec((8, _LANE), lambda i: (i, 0)),
            ),
            compiler_params=compiler_params,
        )(*inputs)
        total = jnp.sum(partial)

    if prefix_n != n:
        # Small unaligned tail (< sub*128 elements) finished in plain jnp.
        tail = jnp.abs(pred_f[prefix_n:].astype(jnp.float32)
                       - tgt_f[prefix_n:].astype(jnp.float32))
        if w_f is not None:
            tail = tail * w_f[prefix_n:].astype(jnp.float32)
        total = total + jnp.sum(tail)

    return total * scale


class L1Loss:
    """JAX/Pallas port of mmdet L1Loss (forward only)."""

    def __init__(self, reduction: str = "mean", loss_weight: float = 1.0):
        assert reduction in ("none", "mean", "sum")
        self.reduction = reduction
        self.loss_weight = float(loss_weight)

    def __call__(self, pred, target, weight=None, avg_factor=None,
                 reduction_override=None):
        assert reduction_override in (None, "none", "mean", "sum")
        reduction = (reduction_override if reduction_override
                     else self.reduction)

        # TODO(synk): the PyTorch module's `not torch.any(weight > 0)` early
        # exit needs a device->host sync and is not traceable; value-wise the
        # weighted path below already returns 0 when all weights are zero, so
        # it is intentionally dropped here.

        # Edge case: empty target.
        if target.size == 0:
            return pred.sum() * 0

        assert pred.shape == target.shape

        if weight is not None and weight.shape != pred.shape:
            # TODO(synk): lower-rank weights are materialized here; streaming
            # the small weight with an in-kernel broadcast would save HBM
            # traffic on the weighted path.
            weight = jnp.broadcast_to(weight, pred.shape)

        loss_w = jnp.asarray(self.loss_weight, jnp.float32)

        if reduction == "none":
            return _l1_pallas(pred, target, weight, loss_w, reduction="none")

        if reduction == "sum":
            return _l1_pallas(pred, target, weight, loss_w, reduction="sum")

        # 'mean': divide the sum by avg_factor (may be a traced/device scalar)
        # or by numel; folded into the runtime scale -> no recompiles.
        if avg_factor is None:
            denom = jnp.asarray(float(np.prod(pred.shape)), jnp.float32)
        else:
            denom = jnp.asarray(avg_factor, jnp.float32)
        scale = loss_w / denom
        return _l1_pallas(pred, target, weight, scale, reduction="sum")


if __name__ == "__main__":
    key = jax.random.PRNGKey(0)
    k1, k2, k3 = jax.random.split(key, 3)

    shape = (2, 4, 16, 16)  # NCHW
    pred = jax.random.normal(k1, shape, dtype=jnp.float32)
    target = jax.random.normal(k2, shape, dtype=jnp.float32)
    weight = jax.random.uniform(k3, shape, dtype=jnp.float32)

    loss_mod = L1Loss(reduction="mean", loss_weight=1.0)

    # mean reduction (default)
    out_mean = loss_mod(pred, target)
    jax.block_until_ready(out_mean)
    ref_mean = jnp.mean(jnp.abs(pred - target))
    np.testing.assert_allclose(np.asarray(out_mean), np.asarray(ref_mean),
                               rtol=1e-5, atol=1e-5)

    # weighted sum reduction
    out_sum = loss_mod(pred, target, weight=weight, reduction_override="sum")
    jax.block_until_ready(out_sum)
    ref_sum = jnp.sum(jnp.abs(pred - target) * weight)
    np.testing.assert_allclose(np.asarray(out_sum), np.asarray(ref_sum),
                               rtol=1e-5, atol=1e-4)

    # 'none' reduction (elementwise)
    out_none = loss_mod(pred, target, weight=weight,
                        reduction_override="none")
    jax.block_until_ready(out_none)
    ref_none = jnp.abs(pred - target) * weight
    np.testing.assert_allclose(np.asarray(out_none), np.asarray(ref_none),
                               rtol=1e-5, atol=1e-5)

    # mean with a runtime (device-scalar) avg_factor: no recompile per value
    avg_factor = jnp.asarray(100.0, jnp.float32)
    out_avg = loss_mod(pred, target, weight=weight, avg_factor=avg_factor)
    jax.block_until_ready(out_avg)
    ref_avg = jnp.sum(jnp.abs(pred - target) * weight) / 100.0
    np.testing.assert_allclose(np.asarray(out_avg), np.asarray(ref_avg),
                               rtol=1e-5, atol=1e-5)

    print("KERNEL_OK")
</pallas_src>

<mosaic_0001>
module attributes {stable_mosaic.version = 11 : i64} {
  func.func @_l1_psum_kernel(%arg0: i32, %arg1: memref<8x128xf32, #tpu.memory_space<vmem>>, %arg2: memref<8x128xf32, #tpu.memory_space<vmem>>, %arg3: memref<8x128xf32, #tpu.memory_space<vmem>>) attributes {dimension_semantics = [#tpu.dimension_semantics<parallel>], iteration_bounds = array<i64: 2>, scalar_prefetch = 0 : i64, scratch_operands = 0 : i64, tpu.core_type = #tpu.core_type<tc>, window_params = [{transform_indices = @transform_0, window_bounds = array<i64: 8, 128>}, {transform_indices = @transform_1, window_bounds = array<i64: 8, 128>}, {transform_indices = @transform_2, window_bounds = array<i64: 8, 128>}]} {
    %c0 = arith.constant 0 : index
    %c0_0 = arith.constant 0 : index
    %0 = vector.load %arg1[%c0, %c0_0] : memref<8x128xf32, #tpu.memory_space<vmem>>, vector<8x128xf32>
    %c0_1 = arith.constant 0 : index
    %c0_2 = arith.constant 0 : index
    %1 = vector.load %arg2[%c0_1, %c0_2] : memref<8x128xf32, #tpu.memory_space<vmem>>, vector<8x128xf32>
    %2 = arith.subf %0, %1 : vector<8x128xf32>
    %3 = math.absf %2 : vector<8x128xf32>
    %4 = vector.shape_cast %3 : vector<8x128xf32> to vector<1x8x128xf32>
    %cst = arith.constant dense<0.000000e+00> : vector<8x128xf32>
    %5 = vector.multi_reduction <add>, %4, %cst [0] : vector<1x8x128xf32> to vector<8x128xf32>
    %c0_3 = arith.constant 0 : index
    %c0_4 = arith.constant 0 : index
    %6 = vector.load %arg3[%c0_3, %c0_4] : memref<8x128xf32, #tpu.memory_space<vmem>>, vector<8x128xf32>
    tpu.vector_store %arg3[%c0_3, %c0_4], %5 {strides = array<i32>} : memref<8x128xf32, #tpu.memory_space<vmem>>, vector<8x128xf32>,
    return
  }
  func.func @transform_0(%arg0: i32) -> (i32, i32) {
    %c0_i32 = arith.constant 0 : i32
    %c0_i32_0 = arith.constant 0 : i32
    return %arg0, %c0_i32 : i32, i32
  }
  func.func @transform_1(%arg0: i32) -> (i32, i32) {
    %c0_i32 = arith.constant 0 : i32
    %c0_i32_0 = arith.constant 0 : i32
    return %arg0, %c0_i32 : i32, i32
  }
  func.func @transform_2(%arg0: i32) -> (i32, i32) {
    %c0_i32 = arith.constant 0 : i32
    %c0_i32_0 = arith.constant 0 : i32
    return %arg0, %c0_i32 : i32, i32
  }
}

</mosaic_0001>

<bundles_post_ra>
// kernel: _l1_pallas.1
= control target key start
LH: loop header
LB: loop body
LE: loop exit
PB: predicated region body
PF: predicated region fallthrough
CT: control target
= control target key end

     0   :  { %s249_s9 = smov 0   ;;  %s277_s0 = inlined_call_operand.vmem [shape: f32[16,128], index: 0, kind: input, shape index: {}]   ;;  %s278_s1 = inlined_call_operand.vmem [shape: f32[16,128], index: 1, kind: input, shape index: {}]   ;;  %s279_s2 = inlined_call_operand.vmem [shape: f32[16,128], index: 2, kind: output, shape index: {}]  }
   0x1 LB: > { %s227_s10 = sadd.s32 4294967295, %s251_s9   ;;  %p231_p0 = scmp.ge.s32.totalorder %s251_s9, 1  ;;  %s251_s9 = sphi %s249_s9, %s12_s9  }
   0x2   : > { %p120_p1 = scmp.lt.s32.totalorder %s251_s9, 3 }
   0x4   : > { %p121_p2 = pnand %p231_p0, %p120_p1 }
   0x5   : > { %p144_p3 = scmp.lt.s32.totalorder (!%p121_p2), %s227_s10, 1 }
   0x6   : > { %124 = sbr.rel (%p121_p2) target bundleno = 21 (0x15), region = 28 }
   0xb   : > { %s281_s10 = smov (!%p144_p3, %s227_s10), 1 }
   0xc   : > { %s232_s11 = sshll.u32 %s281_s10, 3 }
   0xd   : > { %s147_s14 = scalar_lea.vmem %s277_s0, %s232_s11  ;;  %s151_s17 = scalar_lea.vmem %s278_s1, %s232_s11 }
   0xe   : > { %v156_v0 = vld [vmem:[%s147_s14] sm:$0xff]  ;;  %s155_s20 = scalar_lea.vmem %s279_s2, %s232_s11 }
   0xf   : > { %v157_v1 = vld [vmem:[%s151_s17] sm:$0xff] }
  0x10   : > { %v158_v2 = vsub.f32 %v156_v0, %v157_v1 }
  0x12   : > { %v159_v3 = vand.u32 2147483647, %v158_v2 }
  0x14   : > { %161 = vst [vmem:[%s155_s20] sm:$0xff] %v159_v3 }
  0x15 PF: > { %s12_s9 = sadd.s32 1, %s251_s9  }
  0x16   : > { %p9_p4 = scmp.ge.s32.totalorder %s12_s9, 4  }
  0x18   :  { %11 = sbr.rel (!%p9_p4) target bundleno = 1 (0x1), region = 61 }

</bundles_post_ra>
